<compile_context>
chip_gen: v7x
topology: tpu7x:2x2x1
jax: 0.10.0
libtpu: 0.0.40
codegen_flags: <defaults>
</compile_context>

<pallas_src>
import functools

import jax
import jax.numpy as jnp
from jax import lax
from jax.experimental import pallas as pl
from jax.experimental.pallas import tpu as pltpu


def _mhsa_kernel(x_ref, w1_ref, w2_ref, out_ref, attn_ref, *, flatten_heads):
    """One grid step processes TB batch elements.

    x_ref   : (TB, S, D)   input block (native dtype; bf16 feeds the MXU directly)
    w1_ref  : (E, D)       nn.Linear(d_in, d_hidden).weight, pre-cast to x.dtype
    w2_ref  : (H, E)       nn.Linear(d_hidden, n_head).weight, pre-cast to x.dtype
    out_ref : (TB, H, D)   or (TB*H, D) when flatten_heads (sublane-dense stores)
    attn_ref: (TB, H, S)   or (TB*H, S) when flatten_heads; wrapper transposes to (B, S, H)
    """
    TB, S, D = x_ref.shape
    H, E = w2_ref.shape

    x = x_ref[...]                                    # (TB, S, D), native dtype
    w1 = w1_ref[...]                                  # (E, D), x.dtype
    w2 = w2_ref[...]                                  # (H, E), x.dtype

    # ---- matmul 1 on the MXU with a tall M dim: (TB*S, D) x (E, D)^T -> (TB*S, E), f32 acc.
    x2 = x.reshape(TB * S, D)
    acc1 = lax.dot_general(x2, w1, (((1,), (1,)), ((), ())),
                           preferred_element_type=jnp.float32)       # (TB*S, E) f32

    # tanh, then immediately drop back to the activation dtype (half the live footprint,
    # native-rate MXU operands for the scores matmul).
    # TODO(synk): on v6e/v7x a bf16 tanh would halve EUP work if the EUP slot binds.
    h = jnp.tanh(acc1).astype(x.dtype).reshape(TB, S, E)             # (TB, S, E)

    # ---- scores, one batched matmul, directly in the lane-dense (TB, H, S) orientation.
    w2b = jnp.broadcast_to(w2, (TB, H, E))
    scores = jnp.einsum('bhe,bse->bhs', w2b, h,
                        preferred_element_type=jnp.float32)          # (TB, H, S) f32

    # ---- softmax over the sequence axis (last axis here -> full VPU lane utilization).
    m = jnp.max(scores, axis=-1, keepdims=True)                      # (TB, H, 1)
    e = jnp.exp(scores - m)                                          # (TB, H, S)
    denom = jnp.sum(e, axis=-1, keepdims=True)
    attn = e * pl.reciprocal(denom, approx=False)                    # exact normalization

    # ---- output = attn (TB,H,S) @ x (TB,S,D) -> (TB,H,D); one batched matmul, f32 acc.
    out = jnp.einsum('bhs,bsd->bhd', attn.astype(x.dtype), x,
                     preferred_element_type=jnp.float32)             # (TB, H, D) f32

    if flatten_heads:
        # Sublane-dense stores: no H->8 padding, unmasked vst, less writeback DMA.
        out_ref[...] = out.reshape(TB * H, D).astype(out_ref.dtype)
        attn_ref[...] = attn.reshape(TB * H, S).astype(attn_ref.dtype)
    else:
        out_ref[...] = out.astype(out_ref.dtype)
        attn_ref[...] = attn.astype(attn_ref.dtype)


def _pick_batch_tile(B, budget_bytes, est_bytes):
    """Largest divisor of B whose VMEM estimate fits the budget, preferring grids with
    >= 4 steps (v7x: 2 TensorCores x 2 steps each) and an even step count."""
    fitting = [d for d in range(1, B + 1) if B % d == 0 and est_bytes(d) <= budget_bytes]
    if not fitting:
        return 1

    def pref(d):
        steps = B // d
        return (steps >= 4, steps % 2 == 0, d)

    return max(fitting, key=pref)


def multi_head_self_attention(x, w1_weight, w2_weight):
    """x: (B, S, d_in); w1_weight: (d_hidden, d_in); w2_weight: (n_head, d_hidden).

    Weights are in PyTorch nn.Linear.weight layout (no transposes needed).
    Returns (output, attn) matching the PyTorch module (mask=None path):
      output: (B, n_head, d_in)  [squeezed to (B, d_in) if n_head == 1]
      attn  : (B, S, n_head)     softmax over the sequence axis.
    """
    B, S, d_in = x.shape
    n_head, d_hidden = w2_weight.shape
    assert w1_weight.shape == (d_hidden, d_in)

    # Pre-cast weights once in XLA (avoids a per-grid-step VALU cast and halves the
    # resident weight block for bf16 activations).
    w1 = w1_weight.astype(x.dtype)
    w2 = w2_weight.astype(x.dtype)

    itemsize = jnp.dtype(x.dtype).itemsize

    # Generation-aware VMEM budget (v7x has 64 MiB per TensorCore; v5e/v6e have 128 MiB).
    try:
        vmem_cap = int(pltpu.get_tpu_info().vmem_capacity_bytes)
    except Exception:
        vmem_cap = 64 * 1024 * 1024
    budget = int(0.65 * vmem_cap)

    def est_bytes(tb):
        # Double-buffered I/O blocks.
        x_blk = tb * S * d_in * itemsize
        out_blk = tb * n_head * d_in * itemsize
        att_blk = tb * n_head * S * itemsize
        # Weight blocks (constant across the grid; counted double-buffered to stay safe).
        w_bytes = (d_hidden * d_in + n_head * d_hidden) * itemsize
        # In-kernel intermediates: f32 matmul-1 accumulator, cast h, x2 reshape copy,
        # f32 scores + exp, f32 out accumulator, broadcast w2.
        interm = (tb * S * d_hidden * 4
                  + tb * S * d_hidden * itemsize
                  + tb * S * d_in * itemsize
                  + 2 * tb * n_head * S * 4
                  + tb * n_head * d_in * 4
                  + tb * n_head * d_hidden * itemsize)
        return 2 * (x_blk + out_blk + att_blk) + 2 * w_bytes + interm + (2 << 20)

    tb = _pick_batch_tile(B, budget, est_bytes)
    grid = (B // tb,)

    # Flatten the head dim into the output sublane dim only when it removes padding
    # (n_head % 8 != 0) and the resulting block shape is legal ((tb*H) % 8 == 0 or tb == B).
    flatten_heads = (n_head % 8 != 0) and (((tb * n_head) % 8 == 0) or tb == B)

    if flatten_heads:
        out_shapes = (
            jax.ShapeDtypeStruct((B * n_head, d_in), x.dtype),
            jax.ShapeDtypeStruct((B * n_head, S), x.dtype),
        )
        out_specs = [
            pl.BlockSpec((tb * n_head, d_in), lambda b: (b, 0)),
            pl.BlockSpec((tb * n_head, S), lambda b: (b, 0)),
        ]
    else:
        out_shapes = (
            jax.ShapeDtypeStruct((B, n_head, d_in), x.dtype),
            jax.ShapeDtypeStruct((B, n_head, S), x.dtype),   # lane-dense: last dim = S
        )
        out_specs = [
            pl.BlockSpec((tb, n_head, d_in), lambda b: (b, 0, 0)),
            pl.BlockSpec((tb, n_head, S), lambda b: (b, 0, 0)),
        ]

    vmem_limit = int(min(max(est_bytes(tb) + (4 << 20), 32 * 1024 * 1024),
                         int(0.9 * vmem_cap)))

    kernel = functools.partial(_mhsa_kernel, flatten_heads=flatten_heads)

    out_raw, attn_raw = pl.pallas_call(
        kernel,
        out_shape=out_shapes,
        grid_spec=pltpu.PrefetchScalarGridSpec(
            num_scalar_prefetch=0,
            grid=grid,
            in_specs=[
                pl.BlockSpec((tb, S, d_in), lambda b: (b, 0, 0)),
                pl.BlockSpec((d_hidden, d_in), lambda b: (0, 0)),
                pl.BlockSpec((n_head, d_hidden), lambda b: (0, 0)),
            ],
            out_specs=out_specs,
        ),
        compiler_params=pltpu.CompilerParams(
            dimension_semantics=("parallel",),
            vmem_limit_bytes=vmem_limit,
        ),
    )(x, w1, w2)

    # Cheap wrapper-side layout plumbing back to the PyTorch layouts.
    if flatten_heads:
        out = out_raw.reshape(B, n_head, d_in)
        attn_hs = attn_raw.reshape(B, n_head, S)
    else:
        out, attn_hs = out_raw, attn_raw

    attn = jnp.transpose(attn_hs, (0, 2, 1))           # (B, S, n_head)

    if out.shape[1] == 1:  # matches torch's squeeze(1) when n_head == 1
        out = jnp.squeeze(out, axis=1)
    return out, attn


def _xavier_uniform(key, fan_out, fan_in, dtype=jnp.float32):
    # Same bound as torch.nn.init.xavier_uniform_ on an (fan_out, fan_in) weight.
    bound = (6.0 / (fan_in + fan_out)) ** 0.5
    return jax.random.uniform(key, (fan_out, fan_in), dtype=dtype,
                              minval=-bound, maxval=bound)


if __name__ == "__main__":
    # Small deterministic example: batch=2, seq=8, d_in=32, d_hidden=32, n_head=4
    B, S, d_in, d_hidden, n_head = 2, 8, 32, 32, 4

    key = jax.random.PRNGKey(0)
    kx, k1, k2 = jax.random.split(key, 3)

    x = jax.random.normal(kx, (B, S, d_in), dtype=jnp.float32)
    w1 = _xavier_uniform(k1, d_hidden, d_in)     # nn.Linear(d_in, d_hidden).weight
    w2 = _xavier_uniform(k2, n_head, d_hidden)   # nn.Linear(d_hidden, n_head).weight

    out, attn = multi_head_self_attention(x, w1, w2)
    jax.block_until_ready((out, attn))

    # Pure-JAX reference check (same math as the PyTorch forward with mask=None).
    scores_ref = jnp.tanh(x @ w1.T) @ w2.T                    # (B, S, H)
    attn_ref = jax.nn.softmax(scores_ref, axis=1)             # softmax over S
    out_ref = jnp.einsum("bsh,bsd->bhd", attn_ref, x)         # bmm(attn^T, x)

    assert out.shape == (B, n_head, d_in)
    assert attn.shape == (B, S, n_head)
    assert jnp.allclose(attn, attn_ref, atol=2e-3, rtol=2e-3)
    assert jnp.allclose(out, out_ref, atol=2e-3, rtol=2e-3)

    print("KERNEL_OK")
</pallas_src>

<mosaic_0001>
module attributes {stable_mosaic.version = 11 : i64} {
  func.func @_mhsa_kernel(%arg0: i32, %arg1: memref<1x8x32xf32, #tpu.memory_space<vmem>>, %arg2: memref<32x32xf32, #tpu.memory_space<vmem>>, %arg3: memref<4x32xf32, #tpu.memory_space<vmem>>, %arg4: memref<1x4x32xf32, #tpu.memory_space<vmem>>, %arg5: memref<1x4x8xf32, #tpu.memory_space<vmem>>) attributes {dimension_semantics = [#tpu.dimension_semantics<parallel>], iteration_bounds = array<i64: 2>, scalar_prefetch = 0 : i64, scratch_operands = 0 : i64, tpu.core_type = #tpu.core_type<tc>, window_params = [{transform_indices = @transform_0, window_bounds = array<i64: 1, 8, 32>}, {pipeline_mode = #tpu.pipeline_mode<synchronous>, transform_indices = @transform_1, window_bounds = array<i64: 32, 32>}, {pipeline_mode = #tpu.pipeline_mode<synchronous>, transform_indices = @transform_2, window_bounds = array<i64: 4, 32>}, {transform_indices = @transform_3, window_bounds = array<i64: 1, 4, 32>}, {transform_indices = @transform_4, window_bounds = array<i64: 1, 4, 8>}]} {
    %c0 = arith.constant 0 : index
    %c0_0 = arith.constant 0 : index
    %c0_1 = arith.constant 0 : index
    %0 = vector.load %arg1[%c0, %c0_0, %c0_1] : memref<1x8x32xf32, #tpu.memory_space<vmem>>, vector<1x8x32xf32>
    %c0_2 = arith.constant 0 : index
    %c0_3 = arith.constant 0 : index
    %1 = vector.load %arg2[%c0_2, %c0_3] : memref<32x32xf32, #tpu.memory_space<vmem>>, vector<32x32xf32>
    %c0_4 = arith.constant 0 : index
    %c0_5 = arith.constant 0 : index
    %2 = vector.load %arg3[%c0_4, %c0_5] : memref<4x32xf32, #tpu.memory_space<vmem>>, vector<4x32xf32>
    %3 = vector.shape_cast %0 : vector<1x8x32xf32> to vector<8x32xf32>
    %cst = arith.constant dense<0.000000e+00> : vector<8x32xf32>
    %4 = tpu.matmul %3, %1, %cst {dimension_numbers = #tpu.dot_dimension_numbers<[1], [1], [0], [0], [0, 0, 1, 0], [], []>} : vector<8x32xf32>, vector<32x32xf32>, vector<8x32xf32> -> vector<8x32xf32>
    %5 = math.tanh %4 : vector<8x32xf32>
    %6 = vector.shape_cast %5 : vector<8x32xf32> to vector<1x8x32xf32>
    %7 = vector.shape_cast %2 : vector<4x32xf32> to vector<1x4x32xf32>
    "tpu.trace_start"() <{level = 10 : i32, message = "bhe,bse->bhs"}> : () -> ()
    %cst_6 = arith.constant dense<0.000000e+00> : vector<1x4x8xf32>
    %8 = tpu.matmul %7, %6, %cst_6 {dimension_numbers = #tpu.dot_dimension_numbers<[2], [2], [1], [1], [0, 0, 0, 1, 1, 1], [0], [0]>} : vector<1x4x32xf32>, vector<1x8x32xf32>, vector<1x4x8xf32> -> vector<1x4x8xf32>
    "tpu.trace_stop"() : () -> ()
    %cst_7 = arith.constant dense<0xFF800000> : vector<1x4xf32>
    %9 = vector.multi_reduction <maximumf>, %8, %cst_7 [2] : vector<1x4x8xf32> to vector<1x4xf32>
    %10 = vector.shape_cast %9 : vector<1x4xf32> to vector<1x4x1xf32>
    %11 = vector.broadcast %10 : vector<1x4x1xf32> to vector<1x4x8xf32>
    %12 = arith.subf %8, %11 : vector<1x4x8xf32>
    %13 = math.exp %12 : vector<1x4x8xf32>
    %cst_8 = arith.constant dense<0.000000e+00> : vector<1x4xf32>
    %14 = vector.multi_reduction <add>, %13, %cst_8 [2] : vector<1x4x8xf32> to vector<1x4xf32>
    %15 = vector.shape_cast %14 : vector<1x4xf32> to vector<1x4x1xf32>
    %16 = tpu.reciprocal %15 : vector<1x4x1xf32> -> vector<1x4x1xf32>
    %17 = vector.broadcast %16 : vector<1x4x1xf32> to vector<1x4x8xf32>
    %18 = arith.mulf %13, %17 : vector<1x4x8xf32>
    "tpu.trace_start"() <{level = 10 : i32, message = "bhs,bsd->bhd"}> : () -> ()
    %cst_9 = arith.constant dense<0.000000e+00> : vector<1x4x32xf32>
    %19 = tpu.matmul %18, %0, %cst_9 {dimension_numbers = #tpu.dot_dimension_numbers<[2], [1], [1], [2], [0, 0, 0, 1, 1, 2], [0], [0]>} : vector<1x4x8xf32>, vector<1x8x32xf32>, vector<1x4x32xf32> -> vector<1x4x32xf32>
    "tpu.trace_stop"() : () -> ()
    %c0_10 = arith.constant 0 : index
    %c0_11 = arith.constant 0 : index
    %c0_12 = arith.constant 0 : index
    %20 = vector.load %arg4[%c0_10, %c0_11, %c0_12] : memref<1x4x32xf32, #tpu.memory_space<vmem>>, vector<1x4x32xf32>
    tpu.vector_store %arg4[%c0_10, %c0_11, %c0_12], %19 {strides = array<i32>} : memref<1x4x32xf32, #tpu.memory_space<vmem>>, vector<1x4x32xf32>,
    %c0_13 = arith.constant 0 : index
    %c0_14 = arith.constant 0 : index
    %c0_15 = arith.constant 0 : index
    %21 = vector.load %arg5[%c0_13, %c0_14, %c0_15] : memref<1x4x8xf32, #tpu.memory_space<vmem>>, vector<1x4x8xf32>
    tpu.vector_store %arg5[%c0_13, %c0_14, %c0_15], %18 {strides = array<i32>} : memref<1x4x8xf32, #tpu.memory_space<vmem>>, vector<1x4x8xf32>,
    return
  }
  func.func @transform_0(%arg0: i32) -> (i32, i32, i32) {
    %c0_i32 = arith.constant 0 : i32
    %c0_i32_0 = arith.constant 0 : i32
    %c0_i32_1 = arith.constant 0 : i32
    return %arg0, %c0_i32, %c0_i32_0 : i32, i32, i32
  }
  func.func @transform_1(%arg0: i32) -> (i32, i32) {
    %c0_i32 = arith.constant 0 : i32
    %c0_i32_0 = arith.constant 0 : i32
    %c0_i32_1 = arith.constant 0 : i32
    return %c0_i32, %c0_i32_0 : i32, i32
  }
  func.func @transform_2(%arg0: i32) -> (i32, i32) {
    %c0_i32 = arith.constant 0 : i32
    %c0_i32_0 = arith.constant 0 : i32
    %c0_i32_1 = arith.constant 0 : i32
    return %c0_i32, %c0_i32_0 : i32, i32
  }
  func.func @transform_3(%arg0: i32) -> (i32, i32, i32) {
    %c0_i32 = arith.constant 0 : i32
    %c0_i32_0 = arith.constant 0 : i32
    %c0_i32_1 = arith.constant 0 : i32
    return %arg0, %c0_i32, %c0_i32_0 : i32, i32, i32
  }
  func.func @transform_4(%arg0: i32) -> (i32, i32, i32) {
    %c0_i32 = arith.constant 0 : i32
    %c0_i32_0 = arith.constant 0 : i32
    %c0_i32_1 = arith.constant 0 : i32
    return %arg0, %c0_i32, %c0_i32_0 : i32, i32, i32
  }
}

</mosaic_0001>

<bundles_post_ra>
// kernel: tpu_custom_call.1
= control target key start
LH: loop header
LB: loop body
LE: loop exit
PB: predicated region body
PF: predicated region fallthrough
CT: control target
= control target key end

     0   :  { %10 = vsyncpa [#allocation3], 0  ;;  %s1215_s0 = inlined_call_operand.hbm [shape: f32[2,8,32], index: 0, kind: input, shape index: {}]   ;;  %s1216_s1 = inlined_call_operand.hbm [shape: f32[32,32], index: 1, kind: input, shape index: {}]   ;;  %s1217_s2 = inlined_call_operand.vmem [shape: f32[4,32], index: 2, kind: input, shape index: {}]   ;;  %s1218_s3 = inlined_call_operand.hbm [shape: f32[2,4,32], index: 3, kind: output, shape index: {0}]   ;;  %s1219_s4 = inlined_call_operand.hbm [shape: f32[2,4,8], index: 4, kind: output, shape index: {1}]  }
   0x1   :  { %12 = vsyncpa [#allocation3 + $0x1], 0 }
   0x2   :  { %13 = vsyncpa [#allocation6], 0 }
   0x3   :  { %14 = vsyncpa [#allocation4], 0 }
   0x4   :  { %16 = vsyncpa [#allocation4 + $0x1], 0 }
   0x5   :  { %17 = vsyncpa [#allocation9], 0 }
   0x6   :  { %19 = vsyncpa [#allocation9 + $0x1], 0  ;;  %s973_s15 = smov 0   ;;  %s975_s16 = smov 0  }
   0x7   :  { %s977_s17 = smov 0   ;;  %s979_s18 = smov 0  }
   0x8 LB: > { %s994_s19 = sadd.s32 4294967295, %s937_s18   ;;  %s641_s20 = sadd.s32 4294967294, %s937_s18   ;;  %s937_s18 = sphi %s979_s18, %s1239_s18   ;;  %s933_s17 = sphi %s977_s17, %s1238_s17   ;;  %s929_s16 = sphi %s975_s16, %s1237_s16   ;;  %s925_s15 = sphi %s973_s15, %s1236_s15  }
   0x9   : > { %p45_p0 = scmp.ne.s32.totalorder %s929_s16, %s925_s15  ;;  %p1220_p1 = scmp.eq.s32.totalorder %s994_s19, 0 }
   0xa   : > { %p117_p3 = scmp.eq.s32.totalorder %s641_s20, 1  ;;  %p642_p5 = scmp.ge.s32.totalorder %s937_s18, 1 }
   0xb   : > { %p1003_p4 = por %p1220_p1, %p45_p0  ;;  %p150_p7 = scmp.lt.s32.totalorder %s937_s18, 3 }
   0xc   : > { %p1008_p6 = por %p117_p3, %p45_p0  ;;  %s939_s24 = smov [#allocation5]  }
   0xd   : > { %s1223_s21 = scalar_select %p1003_p4, 1, 0 }
   0xe   : > { %s1224_s22 = scalar_select %p1008_p6, 1, 0 }
   0xf   : > { %p1013_p8 = pnand %p642_p5, %p150_p7  ;;  %s162_s25 = sshll.u32 %s939_s24, 4  ;;  %s1017_s25 = int_to_ptr.vmem [resolvable:$true] %s162_s25 }
  0x10   : > { %s1029_s27 = sadd.s32 1, %s937_s18   ;;  %s32_s28 = sadd.s32 1, %s933_s17 }
  0x11   : > { %s1225_s23 = scalar_select %p1013_p8, 1, 0 }
  0x12   : > { %p714_p9 = pneg %p1013_p8  ;;  %s29_s29 = ssub.s32 %s937_s18, %s1029_s27 }
  0x13   : > { %s777_s6 = scalar_lea.hbm %s1216_s1, 512 }
  0x14   : > { %p1024_p11 = pnand %p714_p9, %p1220_p1  ;;  %p778_p12 = scmp.ne.s32.totalorder %s1216_s1, %s777_s6 }
  0x15   : > { %p784_p5 = scmp.lt.u32.totalorder %s777_s6, %s1216_s1 }
  0x16   : > { %p779_p13 = pneg %p1024_p11 }
  0x18   : > { %p780_p0 = pnand %p779_p13, %p778_p12 }
  0x1a   : > { %p781_p3 = pneg %p780_p0 }
  0x1c   : > { %p786_p7 = pnand %p784_p5, %p781_p3 }
  0x1e   : > { %789 = shalt.err (!%p786_p7)
}
  0x1f   : > { %s790_s11 = scalar_lea.vmem %s1017_s25, 512  ;;  %p798_p2 = scmp.lt.s32.totalorder %s1017_s25, %s1017_s25 }
  0x20   : > { %p791_p9 = scmp.ne.s32.totalorder %s1017_s25, %s790_s11  ;;  %p799_p6 = scmp.lt.s32.totalorder %s790_s11, %s790_s11 }
  0x22   : > { %p793_p10 = pnand %p791_p9, %p779_p13  ;;  %p800_p4 = por %p799_p6, %p798_p2 }
  0x24   : > { %p794_p1 = pneg %p793_p10 }
  0x26   : > { %p801_p8 = pnand %p800_p4, %p794_p1 }
  0x28   : > { %804 = shalt.err (!%p801_p8)
}
  0x29   : > { %s940_s12 = smov 128   ;;  %s941_s13 = smov 8  }
  0x2a   : > { %717 = dma.hbm_to_vmem [thread:$0]  (!%p1024_p11), %s1216_s1, 512, %s1017_s25, [#allocation6], %s940_s12, %s940_s12, %s941_s13  }
  0x2b   : > { %p30_p2 = scmp.eq.s32.totalorder %s29_s29, 0  ;;  %p39_p1 = scmp.ne.s32.totalorder %s933_s17, %s929_s16 }
  0x2c   : > { %p40_p4 = scmp.eq.s32.totalorder %s937_s18, 0  ;;  %p730_p6 = scmp.lt.s32.totalorder %s937_s18, 2 }
  0x2d   : > { %s1060_s24 = scalar_select %p30_p2, %s933_s17, %s32_s28  }
  0x2e   : > { %p41_p8 = por %p40_p4, %p39_p1  ;;  %p1227_p10 = scmp.eq.s32.totalorder %s994_s19, 1 }
  0x2f   : > { %s179_s5 = sand.u32 1, %s933_s17   ;;  %s646_s6 = sshll.u32 %s937_s18, 7 }
  0x30   : > { %p1064_p12 = por %p1227_p10, %p39_p1  ;;  %s645_s7 = sshll.u32 %s179_s5, 3 }
  0x31   : > { %s1073_s9 = scalar_lea.hbm %s1215_s0, %s646_s6  ;;  %s183_s25 = scalar_lea.vmem [#allocation2], %s645_s7 }
  0x32   : > { %s190_s28 = sshll.u32 %s183_s25, 4  ;;  %p1075_p11 = pnand %p730_p6, %p41_p8  ;;  %s1079_s28 = int_to_ptr.vmem [resolvable:$true] %s190_s28 }
  0x33   : > { %s180_s10 = scalar_lea.sflag [#allocation3], %s179_s5  ;;  %s805_s11 = scalar_lea.hbm %s1073_s9, 128 }
  0x34   : > { %p806_p13 = scmp.ne.s32.totalorder %s1073_s9, %s805_s11  ;;  %p807_p0 = pneg %p1075_p11 }
  0x35   : > { %s810_s14 = scalar_lea.hbm %s1215_s0, 256  ;;  %p811_p7 = scmp.lt.u32.totalorder %s1073_s9, %s1215_s0 }
  0x36   : > { %p808_p3 = pnand %p807_p0, %p806_p13  ;;  %p812_p9 = scmp.lt.u32.totalorder %s810_s14, %s805_s11 }
  0x37   : > { %p814_p1 = scmp.lt.u32.totalorder %s805_s11, %s1073_s9 }
  0x38   : > { %p809_p5 = pneg %p808_p3  ;;  %p813_p2 = por %p812_p9, %p811_p7 }
  0x3a   : > { %p815_p4 = por %p814_p1, %p813_p2 }
  0x3c   : > { %p816_p6 = pnand %p815_p4, %p809_p5 }
  0x3e   : > { %819 = shalt.err (!%p816_p6)
}
  0x3f   : > { %s820_s5 = scalar_lea.vmem %s1079_s28, 128  ;;  %s942_s7 = smov [#allocation2]  }
  0x40   : > { %p821_p8 = scmp.ne.s32.totalorder %s1079_s28, %s820_s5  ;;  %s825_s26 = sshll.u32 %s942_s7, 4  ;;  %s826_s26 = int_to_ptr.vmem [resolvable:$false] %s825_s26 }
  0x41   : > { %s827_s8 = scalar_lea.vmem %s826_s26, 256  ;;  %p828_p3 = scmp.lt.s32.totalorder %s1079_s28, %s826_s26 }
  0x42   : > { %p823_p10 = pnand %p821_p8, %p807_p0  ;;  %p829_p7 = scmp.lt.s32.totalorder %s827_s8, %s820_s5 }
  0x44   : > { %p824_p13 = pneg %p823_p10  ;;  %p830_p9 = por %p829_p7, %p828_p3 }
  0x46   : > { %p831_p2 = pnand %p830_p9, %p824_p13 }
  0x48   : > { %834 = shalt.err (!%p831_p2)
}
  0x49   : > { %721 = dma.hbm_to_vmem [thread:$0]  (!%p1075_p11), %s1073_s9, 128, %s1079_s28, %s180_s10  }
  0x4a   : > { %p1230_p5 = scmp.ne.s32.totalorder %s1225_s23, 0 }
  0x4b   : > { %s1109_s25 = sand.u32 (!%p1230_p5), 1, %s929_s16   ;;  %p1231_p0 = scmp.ne.s32.totalorder (!%p1230_p5), %s1223_s21, 0 }
  0x4c   : > { %199 = sbr.rel (%p1230_p5) target bundleno = 1083 (0x43b), region = 32  ;;  %s648_s11 = sshll.u32 (!%p1230_p5), %s1109_s25, 3 }
  0x4d   : > { %s202_s12 = scalar_lea.sflag (!%p1230_p5), [#allocation3], %s1109_s25  ;;  %s205_s13 = scalar_lea.vmem (!%p1230_p5), [#allocation2], %s648_s11 }
  0x53   : > { %908 = dma.done.wait (%p1231_p0), %s202_s12, 128  }
  0x54   : > { %910 = vsyncadd (%p1231_p0), %s202_s12, 4294967168  ;;  %p1232_p1 = scmp.eq.s32.totalorder %s994_s19, 0 }
  0x56   : > { %912 = dma.done.wait (%p1232_p1), [#allocation6], 512   ;;  %p1233_p11 = pmov %p1232_p1 }
  0x57   : > { %v943_v0 = vmov 0.0|0.0   ;;  %vm944_vm0 = vmmov 0   ;;  %v945_v1 = vmov 0.0   ;;  %vm245_vm1 = vcmask 261120   ;;  %v240_v2 = vld [vmem:[#allocation5] sm:$0xff]  ;;  %v241_v3 = vld [vmem:[#allocation5 + $0x8] sm:$0xff] }
  0x58   : > { %914 = vsyncadd (%p1233_p11), [#allocation6], 4294966784  ;;  %696 = vmatprep.subr.bf16.mxu0 %v943_v0  ;;  %683 = vmatprep.mubr.msk.f32.mxu0 %vm944_vm0, %v945_v1  ;;  %v697_v4 = vpack.c.bf16 %v241_v3, %v240_v2  ;;  %v242_v5 = vld [vmem:[#allocation5 + $0x10] sm:$0xff]  ;;  %v243_v6 = vld [vmem:[#allocation5 + $0x18] sm:$0xff]  ;;  %vm408_vm3 = vcmask 60416   ;;  %s650_s9 = sshll.u32 %s1109_s25, 2 }
  0x59   : > { %686 = vmatprep.subr.mxu1 %v945_v1  ;;  %688 = vmatprep.mubr.msk.f32.mxu1 %vm944_vm0, %v945_v1  ;;  %vm698_vm2 = vmpackc.low %vm245_vm1, %vm245_vm1  ;;  %v701_v7 = vpack.c.bf16 %v243_v6, %v242_v5  ;;  %v239_v8 = vld [vmem:[%s205_s13] sm:$0xff]  ;;  %vm420_vm4 = vcmask 64512   ;;  %s238_s28 = scalar_lea.vmem [#allocation8], %s650_s9  ;;  %s662_s29 = sshll.u32 %s994_s19, 6 }
  0x5a   : > { %699 = vmatpush3.bf16.xpose.msk.msra.mxu0 %vm698_vm2, %v697_v4  ;;  %v244_v12 = vld [vmem:[%s1217_s2] sm:$0xf]  ;;  %s1144_s20 = scalar_lea.hbm %s1219_s4, %s662_s29  ;;  %s529_s6 = sshll.u32 %s238_s28, 4  ;;  %s530_s6 = int_to_ptr.vmem [resolvable:$true] %s529_s6 }
  0x5b   : > { %700 = vmatprep.subr.bf16.mxu0 %v943_v0  ;;  %s503_s5 = scalar_lea.sflag [#allocation9], %s1109_s25  ;;  %s835_s7 = scalar_lea.vmem %s530_s6, 64 }
  0x5c   : > { %p836_p4 = scmp.ne.s32.totalorder %s530_s6, %s835_s7  ;;  %s946_s26 = smov [#allocation8]  }
  0x5d   : > { %s839_s8 = sshll.u32 %s946_s26, 4  ;;  %s840_s8 = int_to_ptr.vmem [resolvable:$false] %s839_s8 }
  0x5e   : > { %p837_p6 = pnand %p836_p4, %p1064_p12  ;;  %s841_s11 = scalar_lea.vmem %s840_s8, 128 }
  0x5f   : > { %p842_p10 = scmp.lt.s32.totalorder %s530_s6, %s840_s8  ;;  %p843_p13 = scmp.lt.s32.totalorder %s841_s11, %s835_s7 }
  0x60   : > { %p838_p8 = pneg %p837_p6 }
  0x61   : > { %p844_p3 = por %p843_p13, %p842_p10 }
  0x62   : > { %703 = vmatpush3.bf16.xpose.msk.msra.mxu0 %vm698_vm2, %v701_v7 }
  0x63   : > { %p845_p7 = pnand %p844_p3, %p838_p8 }
  0x69   : > { %684 = vmatmul.mubr.msk.f32.vlgmr.msra.gmra.mrb[0].mxu0 %vm245_vm1, %v239_v8 }
 0x13c   : > { %v327_v9 = vpop.f32.mrb[0].mxu0 }
 0x13d   : > { %771 = vtanh.f32 %v327_v9  ;;  %v685_v10 = vpop.f32.mrb[1].mxu0 }
 0x147   : > { %v772_v11 = vpop.eup %771 }
 0x148   : > { %687 = vmatpush3.xpose.msk.msra.mxu1 %vm245_vm1, %v772_v11 }
 0x149   : > { %691 = vmatprep.subr.mxu1 %v945_v1 }
 0x14b   : > { %689 = vmatmul.mubr.msk.f32.vlgmr.msra.gmra.mrb[0].mxu1 %vm245_vm1, %v244_v12 }
 0x14c   : > { %692 = vmatpush3.msra.mxu1 %v239_v8  ;;  %693 = vmatprep.mubr.msk.f32.mxu1 %vm944_vm0, %v945_v1 }
 0x21e   : > { %v404_v13 = vpop.f32.mrb[0].mxu1 }
 0x21f   : > { %v690_v14 = vpop.f32.mrb[1].mxu1  ;;  %v409_v15 = vsel %vm408_vm3, %v404_v13, -inf }
 0x220   : > { %410 = vmax.xlane.f32.xlu0 %v409_v15 }
 0x2ad   : > { %v411_v16 = vpop.xlane.xlu0 %410 }
 0x2ae   : > { %v412_v17 = vsub.f32 %v404_v13, %v411_v16 }
 0x2b0   : > { %v413_v18 = vmul.f32 1.442695, %v412_v17 }
 0x2b2   : > { %773 = vpow2.f32 %v413_v18 }
 0x2bc   : > { %v774_v19 = vpop.eup %773 }
 0x2bd   : > { %v415_v20 = vsel %vm408_vm3, %v774_v19, 0.0 }
 0x2be   : > { %416 = vadd.xlane.f32.xlu0 %v415_v20 }
 0x34b   : > { %v417_v21 = vpop.xlane.xlu0 %416 }
 0x34c   : > { %775 = vrcp.f32 %v417_v21 }
 0x356   : > { %v776_v22 = vpop.eup %775 }
 0x357   : > { %v419_v23 = vmul.f32 %v776_v22, %v774_v19 }
 0x359   : > { %694 = vmatmul.mubr.msk.f32.vlgmr.msra.gmra.mrb[2].mxu1 %vm420_vm4, %v419_v23  ;;  %496 = vst.msk [vmem:[%s238_s28] sm:$0xf] %vm408_vm3, %v419_v23 }
 0x35a   : > { %848 = shalt.err (!%p845_p7)
}
 0x35b   : > { %s849_s12 = scalar_lea.hbm %s1144_s20, 64  ;;  %s853_s23 = scalar_lea.hbm %s1219_s4, 128 }
 0x35c   : > { %p850_p9 = scmp.ne.s32.totalorder %s1144_s20, %s849_s12  ;;  %p854_p0 = scmp.lt.u32.totalorder %s1144_s20, %s1219_s4 }
 0x35d   : > { %p855_p1 = scmp.lt.u32.totalorder %s853_s23, %s849_s12  ;;  %p857_p4 = scmp.lt.u32.totalorder %s849_s12, %s1144_s20 }
 0x35e   : > { %p851_p2 = pnand %p850_p9, %p1064_p12 }
 0x35f   : > { %p856_p11 = por %p855_p1, %p854_p0 }
 0x360   : > { %p852_p5 = pneg %p851_p2 }
 0x361   : > { %p858_p6 = por %p857_p4, %p856_p11 }
 0x363   : > { %p859_p8 = pnand %p858_p6, %p852_p5 }
 0x365   : > { %862 = shalt.err (!%p859_p8)
}
 0x366   : > { %711 = dma.vmem_to_hbm [thread:$0]  (%p1064_p12), %s530_s6, 64, %s1144_s20, %s503_s5   ;;  %vm494_vm5 = vcmask 257024  }
 0x367   : > { %s231_s14 = scalar_lea.vmem [#allocation7], %s650_s9  ;;  %s1171_s11 = scalar_lea.hbm %s1218_s3, %s662_s29 }
 0x368   : > { %s516_s7 = sshll.u32 %s231_s14, 4  ;;  %s498_s12 = scalar_lea.sflag [#allocation4], %s1109_s25  ;;  %s1173_s7 = int_to_ptr.vmem [resolvable:$true] %s516_s7 }
 0x369   : > { %s863_s20 = scalar_lea.vmem %s1173_s7, 64  ;;  %s947_s19 = smov [#allocation7]  }
 0x36a   : > { %p864_p10 = scmp.ne.s32.totalorder %s1173_s7, %s863_s20  ;;  %s867_s9 = sshll.u32 %s947_s19, 4  ;;  %s868_s9 = int_to_ptr.vmem [resolvable:$false] %s867_s9 }
 0x36b   : > { %s869_s6 = scalar_lea.vmem %s868_s9, 128  ;;  %p870_p7 = scmp.lt.s32.totalorder %s1173_s7, %s868_s9 }
 0x36c   : > { %p865_p13 = pnand %p864_p10, %p1064_p12  ;;  %p871_p9 = scmp.lt.s32.totalorder %s869_s6, %s863_s20 }
 0x36e   : > { %p866_p3 = pneg %p865_p13  ;;  %p872_p2 = por %p871_p9, %p870_p7 }
 0x370   : > { %p873_p5 = pnand %p872_p2, %p866_p3 }
 0x42c   : > { %v490_v24 = vpop.f32.mrb[2].mxu1 }
 0x42d   : > { %495 = vst.msk [vmem:[%s231_s14] sm:$0xf] %vm494_vm5, %v490_v24  ;;  %v695_v25 = vpop.f32.mrb[3].mxu1 }
 0x42e   : > { %876 = shalt.err (!%p873_p5)
}
 0x42f   : > { %s877_s25 = scalar_lea.hbm %s1171_s11, 64  ;;  %s881_s13 = scalar_lea.hbm %s1218_s3, 128 }
 0x430   : > { %p878_p0 = scmp.ne.s32.totalorder %s1171_s11, %s877_s25  ;;  %p882_p4 = scmp.lt.u32.totalorder %s1171_s11, %s1218_s3 }
 0x431   : > { %p883_p6 = scmp.lt.u32.totalorder %s881_s13, %s877_s25  ;;  %p885_p10 = scmp.lt.u32.totalorder %s877_s25, %s1171_s11 }
 0x432   : > { %p879_p1 = pnand %p878_p0, %p1064_p12 }
 0x433   : > { %p884_p8 = por %p883_p6, %p882_p4 }
 0x434   : > { %p880_p11 = pneg %p879_p1 }
 0x435   : > { %p886_p13 = por %p885_p10, %p884_p8 }
 0x437   : > { %p887_p3 = pnand %p886_p13, %p880_p11 }
 0x439   : > { %890 = shalt.err (!%p887_p3)
}
 0x43a   : > { %710 = dma.vmem_to_hbm [thread:$0]  (%p1064_p12), %s1173_s7, 64, %s1171_s11, %s498_s12  }
 0x43b PF: > { %s541_s28 = sand.u32 1, %s925_s15   ;;  %p1234_p7 = scmp.ne.s32.totalorder %s1224_s22, 0 }
 0x43c   : > { %p1235_p9 = scmp.ge.s32.totalorder %s937_s18, 2  ;;  %s542_s10 = scalar_lea.sflag [#allocation4], %s541_s28 }
 0x43e   : > { %p723_p2 = pnand %p1235_p9, %p1234_p7 }
 0x440   : > { %916 = dma.done.wait (!%p723_p2), %s542_s10, 64  }
 0x441   : > { %918 = vsyncadd (!%p723_p2), %s542_s10, 4294967232  ;;  %s551_s14 = scalar_lea.sflag [#allocation9], %s541_s28 }
 0x442   : > { %920 = dma.done.wait (!%p723_p2), %s551_s14, 64  }
 0x443   : > { %922 = vsyncadd (!%p723_p2), %s551_s14, 4294967232  ;;  %p22_p12 = scmp.ge.s32.totalorder %s1029_s27, 4   ;;  %s1236_s15 = smov %s929_s16 }
 0x444   : > { %s1237_s16 = smov %s933_s17  ;;  %s1238_s17 = smov %s1060_s24 }
 0x445   : > { %s1239_s18 = smov %s1029_s27  ;;  %24 = sbr.rel (!%p22_p12) target bundleno = 8 (0x8), region = 98 }
 0x44c   :  { %556 = vsyncpa [#allocation3], 1 }
 0x44d   :  { %558 = vsyncpa [#allocation3 + $0x1], 1 }
 0x44e   :  { %559 = vsyncpa [#allocation6], 1 }
 0x44f   :  { %560 = vsyncpa [#allocation4], 1 }
 0x450   :  { %562 = vsyncpa [#allocation4 + $0x1], 1 }
 0x451   :  { %563 = vsyncpa [#allocation9], 1 }
 0x452   :  { %565 = vsyncpa [#allocation9 + $0x1], 1 }

</bundles_post_ra>
